<compile_context>
chip_gen: v7x
topology: tpu7x:2x2x1
jax: 0.10.0
libtpu: 0.0.40
codegen_flags: <defaults>
</compile_context>

<pallas_src>
import functools

import jax
import jax.numpy as jnp
from jax.experimental import pallas as pl
from jax.experimental.pallas import tpu as pltpu


def _round_up(v, m):
    return (v + m - 1) // m * m


def dropout_net_kernel(x_ref, w1_ref, b1_ref, w2_ref, b2_ref, bits_ref, o_ref,
                       *, keep_threshold):
    # ---- fc1: x @ W1 (bf16 MXU, f32 accumulate) + b1, then relu ------------
    h = jnp.dot(x_ref[...], w1_ref[...], preferred_element_type=jnp.float32)
    h = jnp.maximum(h + b1_ref[...], 0.0)

    # ---- dropout(p), training=True semantics --------------------------------
    # keep iff uniform uint32 bits >= p * 2^32  =>  P(keep) = 1 - p.
    # The 1/(1-p) scale is pre-folded into w2, so no per-element multiply here.
    keep = bits_ref[...] >= jnp.uint32(keep_threshold)
    h = jnp.where(keep, h, 0.0)

    # ---- fc2: h @ W2 (bf16 MXU, f32 accumulate) + b2 -------------------------
    out = jnp.dot(h.astype(w2_ref.dtype), w2_ref[...],
                  preferred_element_type=jnp.float32)
    o_ref[...] = (out + b2_ref[...]).astype(o_ref.dtype)


def dropout_net_forward(x, w1, b1, w2, b2, *, p, key, tile_b=256):
    """Forward pass of DropoutNet: fc2(dropout(relu(fc1(x)), p)).

    x:  [B, dim_input] float32
    w1: [dim_input, hidden]   b1: [hidden]
    w2: [hidden, dim_output]  b2: [dim_output]
    """
    if not (0.0 <= p < 1.0):
        # TODO(synk): p == 1.0 (everything dropped, inf scale) is a degenerate case.
        raise ValueError("p must be in [0, 1)")

    B, d_in = x.shape
    hidden = w1.shape[1]
    d_out = w2.shape[1]

    # --- pad feature dims to lane-dense multiples of 128; batch to the tile ---
    d_in_p = _round_up(d_in, 128)
    h_p = _round_up(hidden, 128)
    d_out_p = _round_up(d_out, 128)
    tile_b = min(tile_b, _round_up(B, 8))
    b_p = _round_up(B, tile_b)

    # --- operand prep: bf16 MXU inputs, f32 biases, fold 1/(1-p) into w2 ------
    scale = 1.0 / (1.0 - p)
    x_p = jnp.zeros((b_p, d_in_p), jnp.bfloat16).at[:B, :d_in].set(
        x.astype(jnp.bfloat16))
    w1_p = jnp.zeros((d_in_p, h_p), jnp.bfloat16).at[:d_in, :hidden].set(
        w1.astype(jnp.bfloat16))
    b1_p = jnp.zeros((1, h_p), jnp.float32).at[0, :hidden].set(
        b1.astype(jnp.float32))
    w2_p = jnp.zeros((h_p, d_out_p), jnp.bfloat16).at[:hidden, :d_out].set(
        (w2.astype(jnp.float32) * scale).astype(jnp.bfloat16))
    b2_p = jnp.zeros((1, d_out_p), jnp.float32).at[0, :d_out].set(
        b2.astype(jnp.float32))

    # --- uniform uint32 bits for the dropout mask (one per hidden activation) --
    bits = jax.random.bits(key, (b_p, h_p), dtype=jnp.uint32)
    keep_threshold = min(int(round(p * 4294967296.0)), 4294967295)

    kernel = functools.partial(dropout_net_kernel, keep_threshold=keep_threshold)

    grid = (b_p // tile_b,)
    out_padded = pl.pallas_call(
        kernel,
        out_shape=jax.ShapeDtypeStruct((b_p, d_out_p), jnp.float32),
        grid=grid,
        in_specs=[
            pl.BlockSpec((tile_b, d_in_p), lambda i: (i, 0)),   # x tile (pipelined)
            pl.BlockSpec((d_in_p, h_p),    lambda i: (0, 0)),   # w1 (VMEM-resident)
            pl.BlockSpec((1, h_p),         lambda i: (0, 0)),   # b1 (VMEM-resident)
            pl.BlockSpec((h_p, d_out_p),   lambda i: (0, 0)),   # w2 (VMEM-resident)
            pl.BlockSpec((1, d_out_p),     lambda i: (0, 0)),   # b2 (VMEM-resident)
            pl.BlockSpec((tile_b, h_p),    lambda i: (i, 0)),   # dropout bits tile
        ],
        out_specs=pl.BlockSpec((tile_b, d_out_p), lambda i: (i, 0)),
        compiler_params=pltpu.CompilerParams(
            dimension_semantics=("parallel",),      # megacore split on v7x
            vmem_limit_bytes=64 * 1024 * 1024,
        ),
    )(x_p, w1_p, b1_p, w2_p, b2_p, bits)

    return out_padded[:B, :d_out]


def init_params(key, dim_input, hidden_size, dim_output):
    """Deterministic PyTorch-like (Kaiming-uniform) init; weights stored as [in, out]."""
    k1, k2, k3, k4 = jax.random.split(key, 4)
    bound1 = 1.0 / jnp.sqrt(dim_input)
    bound2 = 1.0 / jnp.sqrt(hidden_size)
    w1 = jax.random.uniform(k1, (dim_input, hidden_size), jnp.float32, -bound1, bound1)
    b1 = jax.random.uniform(k2, (hidden_size,), jnp.float32, -bound1, bound1)
    w2 = jax.random.uniform(k3, (hidden_size, dim_output), jnp.float32, -bound2, bound2)
    b2 = jax.random.uniform(k4, (dim_output,), jnp.float32, -bound2, bound2)
    return w1, b1, w2, b2


if __name__ == "__main__":
    # Small shapes consistent with the module's forward (x: [batch, dim_input]).
    batch, dim_input, hidden_size, dim_output = 8, 32, 64, 8
    p = 0.5

    key = jax.random.PRNGKey(0)
    k_x, k_params, k_drop = jax.random.split(key, 3)
    x = jax.random.normal(k_x, (batch, dim_input), dtype=jnp.float32)
    w1, b1, w2, b2 = init_params(k_params, dim_input, hidden_size, dim_output)

    out = dropout_net_forward(x, w1, b1, w2, b2, p=p, key=k_drop)
    out = jax.block_until_ready(out)

    assert out.shape == (batch, dim_output)
    assert out.dtype == jnp.float32
    print("KERNEL_OK")
</pallas_src>

<mosaic_0001>
module attributes {stable_mosaic.version = 11 : i64} {
  func.func @dropout_net_kernel(%arg0: i32, %arg1: memref<8x128xbf16, #tpu.memory_space<vmem>>, %arg2: memref<128x128xbf16, #tpu.memory_space<vmem>>, %arg3: memref<1x128xf32, #tpu.memory_space<vmem>>, %arg4: memref<128x128xbf16, #tpu.memory_space<vmem>>, %arg5: memref<1x128xf32, #tpu.memory_space<vmem>>, %arg6: memref<8x128xi32, #tpu.memory_space<vmem>>, %arg7: memref<8x128xf32, #tpu.memory_space<vmem>>) attributes {dimension_semantics = [#tpu.dimension_semantics<parallel>], iteration_bounds = array<i64: 1>, scalar_prefetch = 0 : i64, scratch_operands = 0 : i64, tpu.core_type = #tpu.core_type<tc>, window_params = [{transform_indices = @transform_0, window_bounds = array<i64: 8, 128>}, {pipeline_mode = #tpu.pipeline_mode<synchronous>, transform_indices = @transform_1, window_bounds = array<i64: 128, 128>}, {pipeline_mode = #tpu.pipeline_mode<synchronous>, transform_indices = @transform_2, window_bounds = array<i64: 1, 128>}, {pipeline_mode = #tpu.pipeline_mode<synchronous>, transform_indices = @transform_3, window_bounds = array<i64: 128, 128>}, {pipeline_mode = #tpu.pipeline_mode<synchronous>, transform_indices = @transform_4, window_bounds = array<i64: 1, 128>}, {transform_indices = @transform_5, window_bounds = array<i64: 8, 128>}, {transform_indices = @transform_6, window_bounds = array<i64: 8, 128>}]} {
    %c0 = arith.constant 0 : index
    %c0_0 = arith.constant 0 : index
    %0 = vector.load %arg1[%c0, %c0_0] : memref<8x128xbf16, #tpu.memory_space<vmem>>, vector<8x128xbf16>
    %c0_1 = arith.constant 0 : index
    %c0_2 = arith.constant 0 : index
    %1 = vector.load %arg2[%c0_1, %c0_2] : memref<128x128xbf16, #tpu.memory_space<vmem>>, vector<128x128xbf16>
    %cst = arith.constant dense<0.000000e+00> : vector<8x128xf32>
    %2 = tpu.matmul %0, %1, %cst {dimension_numbers = #tpu.dot_dimension_numbers<[1], [0], [0], [1], [0, 0, 1, 1], [], []>} : vector<8x128xbf16>, vector<128x128xbf16>, vector<8x128xf32> -> vector<8x128xf32>
    %c0_3 = arith.constant 0 : index
    %c0_4 = arith.constant 0 : index
    %3 = vector.load %arg3[%c0_3, %c0_4] : memref<1x128xf32, #tpu.memory_space<vmem>>, vector<1x128xf32>
    %4 = vector.broadcast %3 : vector<1x128xf32> to vector<8x128xf32>
    %5 = arith.addf %2, %4 : vector<8x128xf32>
    %cst_5 = arith.constant 0.000000e+00 : f32
    %6 = vector.broadcast %cst_5 : f32 to vector<8x128xf32>
    %7 = arith.maximumf %5, %6 : vector<8x128xf32>
    %c0_6 = arith.constant 0 : index
    %c0_7 = arith.constant 0 : index
    %8 = vector.load %arg6[%c0_6, %c0_7] : memref<8x128xi32, #tpu.memory_space<vmem>>, vector<8x128xi32>
    %c-2147483648_i32 = arith.constant -2147483648 : i32
    %9 = vector.broadcast %c-2147483648_i32 : i32 to vector<8x128xi32>
    %10 = arith.cmpi uge, %8, %9 : vector<8x128xi32>
    %cst_8 = arith.constant 0.000000e+00 : f32
    %11 = vector.broadcast %cst_8 : f32 to vector<8x128xf32>
    %12 = arith.select %10, %7, %11 : vector<8x128xi1>, vector<8x128xf32>
    %13 = arith.truncf %12 : vector<8x128xf32> to vector<8x128xbf16>
    %c0_9 = arith.constant 0 : index
    %c0_10 = arith.constant 0 : index
    %14 = vector.load %arg4[%c0_9, %c0_10] : memref<128x128xbf16, #tpu.memory_space<vmem>>, vector<128x128xbf16>
    %cst_11 = arith.constant dense<0.000000e+00> : vector<8x128xf32>
    %15 = tpu.matmul %13, %14, %cst_11 {dimension_numbers = #tpu.dot_dimension_numbers<[1], [0], [0], [1], [0, 0, 1, 1], [], []>} : vector<8x128xbf16>, vector<128x128xbf16>, vector<8x128xf32> -> vector<8x128xf32>
    %c0_12 = arith.constant 0 : index
    %c0_13 = arith.constant 0 : index
    %16 = vector.load %arg5[%c0_12, %c0_13] : memref<1x128xf32, #tpu.memory_space<vmem>>, vector<1x128xf32>
    %17 = vector.broadcast %16 : vector<1x128xf32> to vector<8x128xf32>
    %18 = arith.addf %15, %17 : vector<8x128xf32>
    %c0_14 = arith.constant 0 : index
    %c0_15 = arith.constant 0 : index
    %19 = vector.load %arg7[%c0_14, %c0_15] : memref<8x128xf32, #tpu.memory_space<vmem>>, vector<8x128xf32>
    tpu.vector_store %arg7[%c0_14, %c0_15], %18 {strides = array<i32>} : memref<8x128xf32, #tpu.memory_space<vmem>>, vector<8x128xf32>,
    return
  }
  func.func @transform_0(%arg0: i32) -> (i32, i32) {
    %c0_i32 = arith.constant 0 : i32
    %c0_i32_0 = arith.constant 0 : i32
    return %arg0, %c0_i32 : i32, i32
  }
  func.func @transform_1(%arg0: i32) -> (i32, i32) {
    %c0_i32 = arith.constant 0 : i32
    %c0_i32_0 = arith.constant 0 : i32
    %c0_i32_1 = arith.constant 0 : i32
    return %c0_i32, %c0_i32_0 : i32, i32
  }
  func.func @transform_2(%arg0: i32) -> (i32, i32) {
    %c0_i32 = arith.constant 0 : i32
    %c0_i32_0 = arith.constant 0 : i32
    %c0_i32_1 = arith.constant 0 : i32
    return %c0_i32, %c0_i32_0 : i32, i32
  }
  func.func @transform_3(%arg0: i32) -> (i32, i32) {
    %c0_i32 = arith.constant 0 : i32
    %c0_i32_0 = arith.constant 0 : i32
    %c0_i32_1 = arith.constant 0 : i32
    return %c0_i32, %c0_i32_0 : i32, i32
  }
  func.func @transform_4(%arg0: i32) -> (i32, i32) {
    %c0_i32 = arith.constant 0 : i32
    %c0_i32_0 = arith.constant 0 : i32
    %c0_i32_1 = arith.constant 0 : i32
    return %c0_i32, %c0_i32_0 : i32, i32
  }
  func.func @transform_5(%arg0: i32) -> (i32, i32) {
    %c0_i32 = arith.constant 0 : i32
    %c0_i32_0 = arith.constant 0 : i32
    return %arg0, %c0_i32 : i32, i32
  }
  func.func @transform_6(%arg0: i32) -> (i32, i32) {
    %c0_i32 = arith.constant 0 : i32
    %c0_i32_0 = arith.constant 0 : i32
    return %arg0, %c0_i32 : i32, i32
  }
}

</mosaic_0001>

<bundles_post_ra>
// kernel: tpu_custom_call.1
= control target key start
LH: loop header
LB: loop body
LE: loop exit
PB: predicated region body
PF: predicated region fallthrough
CT: control target
= control target key end

     0   :  { %11 = vsyncpa [#allocation3], 0  ;;  %s746_s0 = inlined_call_operand.hbm [shape: bf16[8,128], index: 0, kind: input, shape index: {}]   ;;  %s747_s1 = inlined_call_operand.hbm [shape: bf16[128,128], index: 1, kind: input, shape index: {}]   ;;  %s748_s2 = inlined_call_operand.hbm [shape: f32[1,128], index: 2, kind: input, shape index: {}]   ;;  %s749_s3 = inlined_call_operand.hbm [shape: bf16[128,128], index: 3, kind: input, shape index: {}]   ;;  %s750_s4 = inlined_call_operand.hbm [shape: f32[1,128], index: 4, kind: input, shape index: {}]   ;;  %s751_s5 = inlined_call_operand.hbm [shape: u32[8,128], index: 5, kind: input, shape index: {}]   ;;  %s752_s6 = inlined_call_operand.hbm [shape: f32[8,128], index: 6, kind: output, shape index: {}]  }
   0x1   :  { %12 = vsyncpa [#allocation6], 0 }
   0x2   :  { %13 = vsyncpa [#allocation9], 0 }
   0x3   :  { %14 = vsyncpa [#allocation12], 0 }
   0x4   :  { %15 = vsyncpa [#allocation4], 0  ;;  %s616_s21 = smov [#allocation5]   ;;  %s452_s25 = scalar_lea.hbm %s747_s1, 1024 }
   0x5   :  { %s31_s22 = sshll.u32 %s616_s21, 4  ;;  %p453_p0 = scmp.ne.s32.totalorder %s747_s1, %s452_s25  ;;  %s32_s22 = int_to_ptr.vmem [resolvable:$true] %s31_s22 }
   0x6   :  { %p456_p1 = scmp.lt.u32.totalorder %s452_s25, %s747_s1 }
   0x8   :  { %p458_p2 = pnand %p456_p1, %p453_p0 }
   0xa   :  { %461 = shalt.err (!%p458_p2)
}
   0xb   :  { %s462_s30 = scalar_lea.vmem %s32_s22, 1024  ;;  %p467_p4 = scmp.lt.s32.totalorder %s32_s22, %s32_s22 }
   0xc   :  { %p463_p3 = scmp.ne.s32.totalorder %s32_s22, %s462_s30  ;;  %p468_p5 = scmp.lt.s32.totalorder %s462_s30, %s462_s30 }
   0xe   :  { %p469_p6 = por %p468_p5, %p467_p4 }
  0x10   :  { %p470_p7 = pnand %p469_p6, %p463_p3 }
  0x12   :  { %473 = shalt.err (!%p470_p7)
}
  0x13   :  { %s617_s7 = smov 64   ;;  %s618_s8 = smov 4  }
  0x14   :  { %37 = dma.hbm_to_vmem [thread:$0]  %s747_s1, 1024, %s32_s22, [#allocation6], %s617_s7, %s617_s7, %s618_s8  }
  0x15   :  { %s619_s11 = smov [#allocation8]   ;;  %s620_s13 = smov [#allocation2]  }
  0x16   :  { %s53_s12 = sshll.u32 %s619_s11, 4  ;;  %s22_s14 = sshll.u32 %s620_s13, 4  ;;  %s54_s12 = int_to_ptr.vmem [resolvable:$true] %s53_s12  ;;  %s23_s14 = int_to_ptr.vmem [resolvable:$true] %s22_s14 }
  0x17   :  { %s474_s17 = scalar_lea.hbm %s749_s3, 1024 }
  0x18   :  { %p475_p8 = scmp.ne.s32.totalorder %s749_s3, %s474_s17  ;;  %p478_p9 = scmp.lt.u32.totalorder %s474_s17, %s749_s3 }
  0x1a   :  { %p480_p10 = pnand %p478_p9, %p475_p8 }
  0x1c   :  { %483 = shalt.err (!%p480_p10)
}
  0x1d   :  { %s484_s1 = scalar_lea.vmem %s54_s12, 1024  ;;  %p489_p12 = scmp.lt.s32.totalorder %s54_s12, %s54_s12 }
  0x1e   :  { %p485_p11 = scmp.ne.s32.totalorder %s54_s12, %s484_s1  ;;  %p490_p13 = scmp.lt.s32.totalorder %s484_s1, %s484_s1 }
  0x20   :  { %p491_p0 = por %p490_p13, %p489_p12 }
  0x22   :  { %p492_p1 = pnand %p491_p0, %p485_p11 }
  0x24   :  { %495 = shalt.err (!%p492_p1)
}
  0x25   :  { %59 = dma.hbm_to_vmem [thread:$0]  %s749_s3, 1024, %s54_s12, [#allocation9], %s617_s7, %s617_s7, %s618_s8  }
  0x26   :  { %s496_s26 = scalar_lea.hbm %s746_s0, 64 }
  0x27   :  { %p497_p2 = scmp.ne.s32.totalorder %s746_s0, %s496_s26  ;;  %p500_p3 = scmp.lt.u32.totalorder %s496_s26, %s746_s0 }
  0x29   :  { %p502_p4 = pnand %p500_p3, %p497_p2 }
  0x2b   :  { %505 = shalt.err (!%p502_p4)
}
  0x2c   :  { %s506_s9 = scalar_lea.vmem %s23_s14, 64  ;;  %p511_p6 = scmp.lt.s32.totalorder %s23_s14, %s23_s14 }
  0x2d   :  { %p507_p5 = scmp.ne.s32.totalorder %s23_s14, %s506_s9  ;;  %p512_p7 = scmp.lt.s32.totalorder %s506_s9, %s506_s9 }
  0x2f   :  { %p513_p8 = por %p512_p7, %p511_p6 }
  0x31   :  { %p514_p9 = pnand %p513_p8, %p507_p5 }
  0x33   :  { %517 = shalt.err (!%p514_p9)
}
  0x34   :  { %25 = dma.hbm_to_vmem [thread:$0]  %s746_s0, 64, %s23_s14, [#allocation3]  }
  0x35   :  { %s621_s8 = smov [#allocation7]   ;;  %s622_s11 = smov [#allocation10]  }
  0x36   :  { %s44_s10 = sshll.u32 %s621_s8, 4  ;;  %s66_s12 = sshll.u32 %s622_s11, 4  ;;  %s45_s10 = int_to_ptr.vmem [resolvable:$true] %s44_s10  ;;  %s67_s12 = int_to_ptr.vmem [resolvable:$true] %s66_s12 }
  0x37   :  { %s518_s16 = scalar_lea.hbm %s748_s2, 16 }
  0x38   :  { %p519_p10 = scmp.ne.s32.totalorder %s748_s2, %s518_s16  ;;  %p522_p11 = scmp.lt.u32.totalorder %s518_s16, %s748_s2 }
  0x3a   :  { %p524_p12 = pnand %p522_p11, %p519_p10 }
  0x3c   :  { %527 = shalt.err (!%p524_p12)
}
  0x3d   :  { %s528_s0 = scalar_lea.vmem %s45_s10, 16  ;;  %s532_s14 = scalar_lea.vmem %s45_s10, 32 }
  0x3e   :  { %p529_p13 = scmp.ne.s32.totalorder %s45_s10, %s528_s0  ;;  %p533_p0 = scmp.lt.s32.totalorder %s45_s10, %s45_s10 }
  0x3f   :  { %p534_p1 = scmp.lt.s32.totalorder %s532_s14, %s528_s0 }
  0x41   :  { %p535_p2 = por %p534_p1, %p533_p0 }
  0x43   :  { %p536_p3 = pnand %p535_p2, %p529_p13 }
  0x45   :  { %539 = shalt.err (!%p536_p3)
}
  0x46   :  { %47 = dma.hbm_to_vmem [thread:$0]  %s748_s2, 16, %s45_s10, [#allocation6]  }
  0x47   :  { %s540_s24 = scalar_lea.hbm %s750_s4, 16 }
  0x48   :  { %p541_p4 = scmp.ne.s32.totalorder %s750_s4, %s540_s24  ;;  %p544_p5 = scmp.lt.u32.totalorder %s540_s24, %s750_s4 }
  0x4a   :  { %p546_p6 = pnand %p544_p5, %p541_p4 }
  0x4c   :  { %549 = shalt.err (!%p546_p6)
}
  0x4d   :  { %s550_s29 = scalar_lea.vmem %s67_s12, 16  ;;  %s554_s30 = scalar_lea.vmem %s67_s12, 32 }
  0x4e   :  { %p551_p7 = scmp.ne.s32.totalorder %s67_s12, %s550_s29  ;;  %p555_p8 = scmp.lt.s32.totalorder %s67_s12, %s67_s12 }
  0x4f   :  { %p556_p9 = scmp.lt.s32.totalorder %s554_s30, %s550_s29 }
  0x51   :  { %p557_p10 = por %p556_p9, %p555_p8 }
  0x53   :  { %p558_p11 = pnand %p557_p10, %p551_p7 }
  0x55   :  { %561 = shalt.err (!%p558_p11)
}
  0x56   :  { %69 = dma.hbm_to_vmem [thread:$0]  %s750_s4, 16, %s67_s12, [#allocation9]  }
  0x57   :  { %s623_s3 = smov [#allocation11]   ;;  %s562_s11 = scalar_lea.hbm %s751_s5, 128 }
  0x58   :  { %s76_s7 = sshll.u32 %s623_s3, 4  ;;  %p563_p12 = scmp.ne.s32.totalorder %s751_s5, %s562_s11  ;;  %s77_s7 = int_to_ptr.vmem [resolvable:$true] %s76_s7 }
  0x59   :  { %p566_p13 = scmp.lt.u32.totalorder %s562_s11, %s751_s5 }
  0x5b   :  { %p568_p0 = pnand %p566_p13, %p563_p12 }
  0x5d   :  { %571 = shalt.err (!%p568_p0)
}
  0x5e   :  { %s572_s18 = scalar_lea.vmem %s77_s7, 128  ;;  %p577_p2 = scmp.lt.s32.totalorder %s77_s7, %s77_s7 }
  0x5f   :  { %p573_p1 = scmp.ne.s32.totalorder %s77_s7, %s572_s18  ;;  %p578_p3 = scmp.lt.s32.totalorder %s572_s18, %s572_s18 }
  0x61   :  { %p579_p4 = por %p578_p3, %p577_p2 }
  0x63   :  { %p580_p5 = pnand %p579_p4, %p573_p1 }
  0x65   :  { %583 = shalt.err (!%p580_p5)
}
  0x66   :  { %79 = dma.hbm_to_vmem [thread:$0]  %s751_s5, 128, %s77_s7, [#allocation12]  }
  0x67   :  { %606 = dma.done.wait [#allocation3], 64  }
  0x68   :  { %607 = vsyncadd [#allocation3], 4294967232 }
  0x69   :  { %608 = dma.done.wait [#allocation6], 1040  }
  0x6a   :  { %609 = vsyncadd [#allocation6], 4294966256 }
  0x6b   :  { %610 = dma.done.wait [#allocation9], 1040  }
  0x6c   :  { %611 = vsyncadd [#allocation9], 4294966256 }
  0x6d   :  { %612 = dma.done.wait [#allocation12], 128  }
  0x6e   :  { %613 = vsyncadd [#allocation12], 4294967168  ;;  %v624_v0 = vmov 0.0   ;;  %vm625_vm0 = vmmov 0   ;;  %v436_v1 = vld [vmem:[#allocation5] sm:$0xff]   ;;  %v437_v2 = vld [vmem:[#allocation5 + $0x8] sm:$0xff]  }
  0x6f   :  { %385 = vmatprep.subr.bf16.mxu0 %v624_v0  ;;  %401 = vmatprep.mubr.msk.bf16.mxu0 %vm625_vm0, %v624_v0  ;;  %v438_v3 = vld [vmem:[#allocation5 + $0x10] sm:$0xff]   ;;  %v444_v4 = vld [vmem:[#allocation8] sm:$0xff]   ;;  %v439_v5 = vld [vmem:[#allocation5 + $0x18] sm:$0xff]   ;;  %s626_s5 = smov [#allocation13]  }
  0x70   :  { %405 = vmatprep.subr.bf16.mxu1 %v624_v0  ;;  %421 = vmatprep.mubr.msk.bf16.mxu1 %vm625_vm0, %v624_v0  ;;  %v445_v6 = vld [vmem:[#allocation8 + $0x8] sm:$0xff]   ;;  %v440_v7 = vld [vmem:[#allocation5 + $0x20] sm:$0xff]   ;;  %v446_v8 = vld [vmem:[#allocation8 + $0x10] sm:$0xff]   ;;  %s334_s19 = sshll.u32 %s626_s5, 4  ;;  %s335_s19 = int_to_ptr.vmem [resolvable:$true] %s334_s19 }
  0x71   :  { %386 = vmatpush3.bf16.msra.mxu0 %v436_v1  ;;  %406 = vmatpush3.bf16.msra.mxu1 %v444_v4  ;;  %v441_v9 = vld [vmem:[#allocation5 + $0x28] sm:$0xff]   ;;  %v447_v10 = vld [vmem:[#allocation8 + $0x18] sm:$0xff]   ;;  %v442_v11 = vld [vmem:[#allocation5 + $0x30] sm:$0xff]   ;;  %s584_s20 = scalar_lea.vmem %s335_s19, 128  ;;  %p589_p7 = scmp.lt.s32.totalorder %s335_s19, %s335_s19 }
  0x72   :  { %387 = vmatprep.subr.bf16.mxu0 %v624_v0  ;;  %407 = vmatprep.subr.bf16.mxu1 %v624_v0  ;;  %v448_v12 = vld [vmem:[#allocation8 + $0x20] sm:$0xff]   ;;  %v443_v13 = vld [vmem:[#allocation5 + $0x38] sm:$0xff]   ;;  %v449_v14 = vld [vmem:[#allocation8 + $0x28] sm:$0xff]   ;;  %p585_p6 = scmp.ne.s32.totalorder %s335_s19, %s584_s20  ;;  %p590_p8 = scmp.lt.s32.totalorder %s584_s20, %s584_s20 }
  0x73   :  { %v99_v15 = vld [vmem:[#allocation2] sm:$0xf]  ;;  %v450_v16 = vld [vmem:[#allocation8 + $0x30] sm:$0xff]   ;;  %v346_v18 = vld [vmem:[#allocation7] ss:$0 sm:$0xff] }
  0x74   :  { %v451_v17 = vld [vmem:[#allocation8 + $0x38] sm:$0xff]   ;;  %v212_v19 = vld [vmem:[#allocation11] sm:$0xff]  ;;  %v355_v27 = vld [vmem:[#allocation10] ss:$0 sm:$0xff]  ;;  %p591_p9 = por %p590_p8, %p589_p7 }
  0x75   :  { %388 = vmatpush3.bf16.msra.mxu0 %v437_v2  ;;  %408 = vmatpush3.bf16.msra.mxu1 %v445_v6  ;;  %vm213_vm1 = vcmp.ge.u32.totalorder %v212_v19, 2147483648 }
  0x76   :  { %389 = vmatprep.subr.bf16.mxu0 %v624_v0  ;;  %409 = vmatprep.subr.bf16.mxu1 %v624_v0  ;;  %vm364_vm2 = vmpackc.low %vm213_vm1, %vm213_vm1  ;;  %p592_p10 = pnand %p591_p9, %p585_p6 }
  0x79   :  { %390 = vmatpush3.bf16.msra.mxu0 %v438_v3  ;;  %410 = vmatpush3.bf16.msra.mxu1 %v446_v8 }
  0x7a   :  { %391 = vmatprep.subr.bf16.mxu0 %v624_v0  ;;  %411 = vmatprep.subr.bf16.mxu1 %v624_v0 }
  0x7d   :  { %392 = vmatpush3.bf16.msra.mxu0 %v439_v5  ;;  %412 = vmatpush3.bf16.msra.mxu1 %v447_v10 }
  0x7e   :  { %393 = vmatprep.subr.bf16.mxu0 %v624_v0  ;;  %413 = vmatprep.subr.bf16.mxu1 %v624_v0 }
  0x81   :  { %394 = vmatpush3.bf16.msra.mxu0 %v440_v7  ;;  %414 = vmatpush3.bf16.msra.mxu1 %v448_v12 }
  0x82   :  { %395 = vmatprep.subr.bf16.mxu0 %v624_v0  ;;  %415 = vmatprep.subr.bf16.mxu1 %v624_v0 }
  0x85   :  { %396 = vmatpush3.bf16.msra.mxu0 %v441_v9  ;;  %416 = vmatpush3.bf16.msra.mxu1 %v449_v14 }
  0x86   :  { %397 = vmatprep.subr.bf16.mxu0 %v624_v0  ;;  %417 = vmatprep.subr.bf16.mxu1 %v624_v0 }
  0x89   :  { %398 = vmatpush3.bf16.msra.mxu0 %v442_v11  ;;  %418 = vmatpush3.bf16.msra.mxu1 %v450_v16 }
  0x8a   :  { %399 = vmatprep.subr.bf16.mxu0 %v624_v0  ;;  %419 = vmatprep.subr.bf16.mxu1 %v624_v0 }
  0x8d   :  { %400 = vmatpush3.bf16.msra.mxu0 %v443_v13  ;;  %420 = vmatpush3.bf16.msra.mxu1 %v451_v17 }
  0x90   :  { %402 = vmatmul.mubr.bf16.vlgmr.msra.gmra.mrb[0].mxu0 %v99_v15 }
 0x163   :  { %v205_v20 = vpop.f32.mrb[0].mxu0 }
 0x164   :  { %v206_v21 = vadd.f32 %v346_v18, %v205_v20  ;;  %v403_v22 = vpop.f32.mrb[1].mxu0 }
 0x165   :  { %v208_v23 = vpop.f32.mrb[2].mxu0 }
 0x166   :  { %v211_v24 = vmax.f32 %v206_v21, 0.0  ;;  %v404_v25 = vpop.f32.mrb[3].mxu0 }
 0x168   :  { %v365_v26 = vpack.c.bf16 %v211_v24, %v211_v24 }
 0x16a   :  { %422 = vmatmul.mubr.msk.bf16.vlgmr.msra.gmra.mrb[0].mxu1 %vm364_vm2, %v365_v26 }
 0x23d   :  { %v321_v28 = vpop.f32.mrb[0].mxu1 }
 0x23e   :  { %v322_v29 = vadd.f32 %v355_v27, %v321_v28  ;;  %v423_v30 = vpop.f32.mrb[1].mxu1 }
 0x23f   :  { %v324_v31 = vpop.f32.mrb[2].mxu1 }
 0x240   :  { %327 = vst [vmem:[#allocation13] sm:$0xff] %v322_v29  ;;  %v424_v32 = vpop.f32.mrb[3].mxu1 }
 0x241   :  { %595 = shalt.err (!%p592_p10)
}
 0x242   :  { %s596_s21 = scalar_lea.hbm %s752_s6, 128 }
 0x243   :  { %p597_p11 = scmp.ne.s32.totalorder %s752_s6, %s596_s21  ;;  %p600_p12 = scmp.lt.u32.totalorder %s596_s21, %s752_s6 }
 0x245   :  { %p602_p13 = pnand %p600_p12, %p597_p11 }
 0x247   :  { %605 = shalt.err (!%p602_p13)
}
 0x248   :  { %337 = dma.vmem_to_hbm [thread:$0]  %s335_s19, 128, %s752_s6, [#allocation4]  }
 0x249   :  { %614 = dma.done.wait [#allocation4], 128  }
 0x24a   :  { %615 = vsyncadd [#allocation4], 4294967168 }
 0x24b   :  { %341 = vsyncpa [#allocation3], 1 }
 0x24c   :  { %342 = vsyncpa [#allocation6], 1 }
 0x24d   :  { %343 = vsyncpa [#allocation9], 1 }
 0x24e   :  { %344 = vsyncpa [#allocation12], 1 }
 0x24f   :  { %345 = vsyncpa [#allocation4], 1 }

</bundles_post_ra>
